<compile_context>
chip_gen: v5e
topology: v5e:2x2
jax: 0.10.0
libtpu: 0.0.40
codegen_flags: <defaults>
</compile_context>

<pallas_src>
import functools

import jax
import jax.numpy as jnp
from jax.experimental import pallas as pl
from jax.experimental.pallas import tpu as pltpu

_LANE = 128  # TPU lane width; pad feature dims to multiples of this.


def _round_up(n, m):
    return ((n + m - 1) // m) * m


# --------------------------------------------------------------------------
# Kernel
# --------------------------------------------------------------------------
def _mlp_kernel(n_layers, x_ref, *refs):
    """Fused MLP forward for one batch tile.

    refs = (w0, b0, w1, b1, ..., out_ref)
      wi : (d_in_i_padded, d_out_i_padded)   (pre-transposed, maybe bf16)
      bi : (1, d_out_i_padded)               (f32)
    """
    out_ref = refs[-1]
    param_refs = refs[:-1]
    assert len(param_refs) == 2 * n_layers

    h = x_ref[...].astype(jnp.float32)
    for i in range(n_layers):
        if i > 0:
            h = jnp.maximum(h, 0.0)            # ReLU between layers only (f32 VPU)
        w = param_refs[2 * i][...]             # (d_in_p, d_out_p)
        b = param_refs[2 * i + 1][...]         # (1, d_out_p), f32
        # MXU matmul in the weight dtype (f32 or bf16), accumulate in f32.
        h = jnp.dot(h.astype(w.dtype), w, preferred_element_type=jnp.float32) + b
    out_ref[...] = h.astype(out_ref.dtype)     # lane-dense (128-multiple) store


# --------------------------------------------------------------------------
# One-time parameter preparation (transpose + lane padding, hoisted off the
# per-call path)
# --------------------------------------------------------------------------
def prepare_params(weights, biases, compute_dtype=jnp.float32):
    """weights[i]: (d_out_i, d_in_i) torch-Linear layout; biases[i]: (d_out_i,).

    Returns (params, meta):
      params: flat list [w0_T_pad, b0_pad, w1_T_pad, b1_pad, ...]
      meta:   dict with padded dims / real output width.
    Zero padding is semantically exact: padded input columns hit zero weight
    rows, padded output columns get zero weights + zero bias.
    """
    n_layers = len(weights)
    params = []
    dims = []
    prev_out_p = None
    for i, (w, b) in enumerate(zip(weights, biases)):
        w = jnp.asarray(w, jnp.float32)
        b = jnp.asarray(b, jnp.float32)
        d_out, d_in = w.shape
        d_in_p = d_in if i == 0 else prev_out_p
        d_out_p = _round_up(d_out, _LANE)

        w_t = jnp.zeros((d_in_p, d_out_p), jnp.float32)
        w_t = w_t.at[:d_in, :d_out].set(w.T)
        b_p = jnp.zeros((1, d_out_p), jnp.float32)
        b_p = b_p.at[0, :d_out].set(b)

        params.append(w_t.astype(compute_dtype))  # weights may be bf16
        params.append(b_p)                         # bias stays f32
        dims.append((d_in_p, d_out_p))
        prev_out_p = d_out_p

    meta = dict(
        n_layers=n_layers,
        dims=tuple(dims),
        d_in=int(weights[0].shape[1]),
        d_out_final=int(weights[-1].shape[0]),
    )
    return params, meta


# --------------------------------------------------------------------------
# Forward wrapper
# --------------------------------------------------------------------------
def deepnet_forward(x, params, meta, *, tile_b=512):
    """x: (batch, d_inputs) f32. params/meta from prepare_params().
    Returns (batch, d_outputs)."""
    n_layers = meta["n_layers"]
    dims = meta["dims"]
    d_out_final = meta["d_out_final"]
    batch, d_in = x.shape
    assert d_in == meta["d_in"], "input width mismatch with prepared params"
    d_out_p = dims[-1][1]

    # Batch tile: multiple of 8 (sublane), capped so small batches don't pad to
    # a huge tile; 512 rows of f32 at these widths is far below every
    # generation's scoped-VMEM default even with double buffering.
    tb = min(_round_up(batch, 8), _round_up(tile_b, 8))
    batch_p = _round_up(batch, tb)
    if batch_p != batch:
        x = jnp.pad(x, ((0, batch_p - batch), (0, 0)))
    grid = (batch_p // tb,)

    # x / out stream over the batch grid; weights & biases are resident
    # (constant index_map -> no re-DMA between tiles).
    in_specs = [pl.BlockSpec((tb, d_in), lambda i: (i, 0))]
    for (d_in_p, d_out_i_p) in dims:
        in_specs.append(pl.BlockSpec((d_in_p, d_out_i_p), lambda i: (0, 0)))
        in_specs.append(pl.BlockSpec((1, d_out_i_p), lambda i: (0, 0)))
    out_spec = pl.BlockSpec((tb, d_out_p), lambda i: (i, 0))

    itemsize = jnp.dtype(x.dtype).itemsize
    flops = 2 * batch_p * sum(a * b for a, b in dims)
    bytes_accessed = (
        batch_p * d_in * itemsize
        + batch_p * d_out_p * itemsize
        + sum(int(p.size) * jnp.dtype(p.dtype).itemsize for p in params)
    )

    kernel = functools.partial(_mlp_kernel, n_layers)
    out = pl.pallas_call(
        kernel,
        out_shape=jax.ShapeDtypeStruct((batch_p, d_out_p), x.dtype),
        grid=grid,
        in_specs=in_specs,
        out_specs=out_spec,
        compiler_params=pltpu.CompilerParams(
            dimension_semantics=("parallel",),
        ),
        cost_estimate=pl.CostEstimate(
            flops=flops, transcendentals=0, bytes_accessed=bytes_accessed
        ),
    )(x, *params)

    return out[:batch, :d_out_final]


# --------------------------------------------------------------------------
# Init mirroring the PyTorch module + pure-JAX reference
# --------------------------------------------------------------------------
def init_deepnet_params(key, d_inputs, d_outputs, d_hidden=32, num_hidden_layers=0):
    """weight: kaiming_normal_(fan_in) -> std = sqrt(2)/sqrt(fan_in);
    bias: nn.Linear default uniform(-1/sqrt(fan_in), 1/sqrt(fan_in))."""
    dims = []
    d_in = d_inputs
    for _ in range(num_hidden_layers):
        dims.append((d_in, d_hidden))
        d_in = d_hidden
    dims.append((d_in, d_outputs))

    weights, biases = [], []
    for (fan_in, fan_out) in dims:
        key, kw, kb = jax.random.split(key, 3)
        std = jnp.sqrt(2.0) / jnp.sqrt(float(fan_in))
        w = std * jax.random.normal(kw, (fan_out, fan_in), dtype=jnp.float32)
        bound = 1.0 / jnp.sqrt(float(fan_in))
        b = jax.random.uniform(kb, (fan_out,), minval=-bound, maxval=bound,
                               dtype=jnp.float32)
        weights.append(w)
        biases.append(b)
    return weights, biases


def deepnet_ref(x, weights, biases):
    h = x
    for i, (w, b) in enumerate(zip(weights, biases)):
        if i > 0:
            h = jnp.maximum(h, 0.0)
        h = h @ w.T + b
    return h


# --------------------------------------------------------------------------
# Self-test
# --------------------------------------------------------------------------
if __name__ == "__main__":
    key = jax.random.PRNGKey(0)

    batch = 8
    d_inputs = 16
    d_hidden = 32
    num_hidden_layers = 2
    d_outputs = 8

    key, kx = jax.random.split(key)
    x = jax.random.normal(kx, (batch, d_inputs), dtype=jnp.float32)

    weights, biases = init_deepnet_params(
        key, d_inputs, d_outputs, d_hidden=d_hidden,
        num_hidden_layers=num_hidden_layers)
    ref = deepnet_ref(x, weights, biases)

    # --- f32 path (tight tolerance) --------------------------------------
    params_f32, meta = prepare_params(weights, biases, compute_dtype=jnp.float32)
    out = deepnet_forward(x, params_f32, meta)
    out = jax.block_until_ready(out)
    assert out.shape == (batch, d_outputs)
    assert jnp.allclose(out, ref, atol=1e-4, rtol=1e-4), "f32 mismatch vs reference"

    # --- bf16 weights, f32 accumulation (looser tolerance) ---------------
    params_bf16, meta_bf16 = prepare_params(weights, biases,
                                            compute_dtype=jnp.bfloat16)
    out_bf16 = deepnet_forward(x, params_bf16, meta_bf16)
    out_bf16 = jax.block_until_ready(out_bf16)
    assert jnp.allclose(out_bf16, ref, atol=2e-2, rtol=2e-2), "bf16 mismatch vs reference"

    # --- non-tile-multiple batch exercises the grid + pad/slice path ------
    key, kx2 = jax.random.split(key)
    x_big = jax.random.normal(kx2, (40, d_inputs), dtype=jnp.float32)
    out_big = deepnet_forward(x_big, params_f32, meta, tile_b=16)  # grid=(3,)
    out_big = jax.block_until_ready(out_big)
    ref_big = deepnet_ref(x_big, weights, biases)
    assert out_big.shape == (40, d_outputs)
    assert jnp.allclose(out_big, ref_big, atol=1e-4, rtol=1e-4), "tiled mismatch"

    print("KERNEL_OK")
</pallas_src>

<mosaic_0001>
module attributes {stable_mosaic.version = 11 : i64} {
  func.func @_mlp_kernel(%arg0: i32, %arg1: memref<8x16xf32, #tpu.memory_space<vmem>>, %arg2: memref<16x128xf32, #tpu.memory_space<vmem>>, %arg3: memref<1x128xf32, #tpu.memory_space<vmem>>, %arg4: memref<128x128xf32, #tpu.memory_space<vmem>>, %arg5: memref<1x128xf32, #tpu.memory_space<vmem>>, %arg6: memref<128x128xf32, #tpu.memory_space<vmem>>, %arg7: memref<1x128xf32, #tpu.memory_space<vmem>>, %arg8: memref<8x128xf32, #tpu.memory_space<vmem>>) attributes {dimension_semantics = [#tpu.dimension_semantics<parallel>], iteration_bounds = array<i64: 1>, scalar_prefetch = 0 : i64, scratch_operands = 0 : i64, tpu.core_type = #tpu.core_type<tc>, window_params = [{transform_indices = @transform_0, window_bounds = array<i64: 8, 16>}, {pipeline_mode = #tpu.pipeline_mode<synchronous>, transform_indices = @transform_1, window_bounds = array<i64: 16, 128>}, {pipeline_mode = #tpu.pipeline_mode<synchronous>, transform_indices = @transform_2, window_bounds = array<i64: 1, 128>}, {pipeline_mode = #tpu.pipeline_mode<synchronous>, transform_indices = @transform_3, window_bounds = array<i64: 128, 128>}, {pipeline_mode = #tpu.pipeline_mode<synchronous>, transform_indices = @transform_4, window_bounds = array<i64: 1, 128>}, {pipeline_mode = #tpu.pipeline_mode<synchronous>, transform_indices = @transform_5, window_bounds = array<i64: 128, 128>}, {pipeline_mode = #tpu.pipeline_mode<synchronous>, transform_indices = @transform_6, window_bounds = array<i64: 1, 128>}, {transform_indices = @transform_7, window_bounds = array<i64: 8, 128>}]} {
    %c0 = arith.constant 0 : index
    %c0_0 = arith.constant 0 : index
    %0 = vector.load %arg1[%c0, %c0_0] : memref<8x16xf32, #tpu.memory_space<vmem>>, vector<8x16xf32>
    %c0_1 = arith.constant 0 : index
    %c0_2 = arith.constant 0 : index
    %1 = vector.load %arg2[%c0_1, %c0_2] : memref<16x128xf32, #tpu.memory_space<vmem>>, vector<16x128xf32>
    %c0_3 = arith.constant 0 : index
    %c0_4 = arith.constant 0 : index
    %2 = vector.load %arg3[%c0_3, %c0_4] : memref<1x128xf32, #tpu.memory_space<vmem>>, vector<1x128xf32>
    %cst = arith.constant dense<0.000000e+00> : vector<8x128xf32>
    %3 = tpu.matmul %0, %1, %cst {dimension_numbers = #tpu.dot_dimension_numbers<[1], [0], [0], [1], [0, 0, 1, 1], [], []>} : vector<8x16xf32>, vector<16x128xf32>, vector<8x128xf32> -> vector<8x128xf32>
    %4 = vector.broadcast %2 : vector<1x128xf32> to vector<8x128xf32>
    %5 = arith.addf %3, %4 : vector<8x128xf32>
    %cst_5 = arith.constant 0.000000e+00 : f32
    %6 = vector.broadcast %cst_5 : f32 to vector<8x128xf32>
    %7 = arith.maximumf %5, %6 : vector<8x128xf32>
    %c0_6 = arith.constant 0 : index
    %c0_7 = arith.constant 0 : index
    %8 = vector.load %arg4[%c0_6, %c0_7] : memref<128x128xf32, #tpu.memory_space<vmem>>, vector<128x128xf32>
    %c0_8 = arith.constant 0 : index
    %c0_9 = arith.constant 0 : index
    %9 = vector.load %arg5[%c0_8, %c0_9] : memref<1x128xf32, #tpu.memory_space<vmem>>, vector<1x128xf32>
    %cst_10 = arith.constant dense<0.000000e+00> : vector<8x128xf32>
    %10 = tpu.matmul %7, %8, %cst_10 {dimension_numbers = #tpu.dot_dimension_numbers<[1], [0], [0], [1], [0, 0, 1, 1], [], []>} : vector<8x128xf32>, vector<128x128xf32>, vector<8x128xf32> -> vector<8x128xf32>
    %11 = vector.broadcast %9 : vector<1x128xf32> to vector<8x128xf32>
    %12 = arith.addf %10, %11 : vector<8x128xf32>
    %cst_11 = arith.constant 0.000000e+00 : f32
    %13 = vector.broadcast %cst_11 : f32 to vector<8x128xf32>
    %14 = arith.maximumf %12, %13 : vector<8x128xf32>
    %c0_12 = arith.constant 0 : index
    %c0_13 = arith.constant 0 : index
    %15 = vector.load %arg6[%c0_12, %c0_13] : memref<128x128xf32, #tpu.memory_space<vmem>>, vector<128x128xf32>
    %c0_14 = arith.constant 0 : index
    %c0_15 = arith.constant 0 : index
    %16 = vector.load %arg7[%c0_14, %c0_15] : memref<1x128xf32, #tpu.memory_space<vmem>>, vector<1x128xf32>
    %cst_16 = arith.constant dense<0.000000e+00> : vector<8x128xf32>
    %17 = tpu.matmul %14, %15, %cst_16 {dimension_numbers = #tpu.dot_dimension_numbers<[1], [0], [0], [1], [0, 0, 1, 1], [], []>} : vector<8x128xf32>, vector<128x128xf32>, vector<8x128xf32> -> vector<8x128xf32>
    %18 = vector.broadcast %16 : vector<1x128xf32> to vector<8x128xf32>
    %19 = arith.addf %17, %18 : vector<8x128xf32>
    %c0_17 = arith.constant 0 : index
    %c0_18 = arith.constant 0 : index
    %20 = vector.load %arg8[%c0_17, %c0_18] : memref<8x128xf32, #tpu.memory_space<vmem>>, vector<8x128xf32>
    tpu.vector_store %arg8[%c0_17, %c0_18], %19 {strides = array<i32>} : memref<8x128xf32, #tpu.memory_space<vmem>>, vector<8x128xf32>,
    return
  }
  func.func @transform_0(%arg0: i32) -> (i32, i32) {
    %c0_i32 = arith.constant 0 : i32
    %c0_i32_0 = arith.constant 0 : i32
    return %arg0, %c0_i32 : i32, i32
  }
  func.func @transform_1(%arg0: i32) -> (i32, i32) {
    %c0_i32 = arith.constant 0 : i32
    %c0_i32_0 = arith.constant 0 : i32
    %c0_i32_1 = arith.constant 0 : i32
    return %c0_i32, %c0_i32_0 : i32, i32
  }
  func.func @transform_2(%arg0: i32) -> (i32, i32) {
    %c0_i32 = arith.constant 0 : i32
    %c0_i32_0 = arith.constant 0 : i32
    %c0_i32_1 = arith.constant 0 : i32
    return %c0_i32, %c0_i32_0 : i32, i32
  }
  func.func @transform_3(%arg0: i32) -> (i32, i32) {
    %c0_i32 = arith.constant 0 : i32
    %c0_i32_0 = arith.constant 0 : i32
    %c0_i32_1 = arith.constant 0 : i32
    return %c0_i32, %c0_i32_0 : i32, i32
  }
  func.func @transform_4(%arg0: i32) -> (i32, i32) {
    %c0_i32 = arith.constant 0 : i32
    %c0_i32_0 = arith.constant 0 : i32
    %c0_i32_1 = arith.constant 0 : i32
    return %c0_i32, %c0_i32_0 : i32, i32
  }
  func.func @transform_5(%arg0: i32) -> (i32, i32) {
    %c0_i32 = arith.constant 0 : i32
    %c0_i32_0 = arith.constant 0 : i32
    %c0_i32_1 = arith.constant 0 : i32
    return %c0_i32, %c0_i32_0 : i32, i32
  }
  func.func @transform_6(%arg0: i32) -> (i32, i32) {
    %c0_i32 = arith.constant 0 : i32
    %c0_i32_0 = arith.constant 0 : i32
    %c0_i32_1 = arith.constant 0 : i32
    return %c0_i32, %c0_i32_0 : i32, i32
  }
  func.func @transform_7(%arg0: i32) -> (i32, i32) {
    %c0_i32 = arith.constant 0 : i32
    %c0_i32_0 = arith.constant 0 : i32
    return %arg0, %c0_i32 : i32, i32
  }
}

</mosaic_0001>

<bundles_post_ra>
// kernel: tpu_custom_call.1
= control target key start
LH: loop header
LB: loop body
LE: loop exit
PB: predicated region body
PF: predicated region fallthrough
CT: control target
= control target key end

     0   :  { %12 = vsyncpa [#allocation3], 0  ;;  %s431_s0 = inlined_call_operand.hbm [shape: f32[8,16], index: 0, kind: input, shape index: {}]   ;;  %s432_s1 = inlined_call_operand.hbm [shape: f32[16,128], index: 1, kind: input, shape index: {}]   ;;  %s433_s2 = inlined_call_operand.vmem [shape: f32[1,128], index: 2, kind: input, shape index: {}]   ;;  %s434_s3 = inlined_call_operand.hbm [shape: f32[128,128], index: 3, kind: input, shape index: {}]   ;;  %s435_s4 = inlined_call_operand.vmem [shape: f32[1,128], index: 4, kind: input, shape index: {}]   ;;  %s436_s5 = inlined_call_operand.hbm [shape: f32[128,128], index: 5, kind: input, shape index: {}]   ;;  %s437_s6 = inlined_call_operand.vmem [shape: f32[1,128], index: 6, kind: input, shape index: {}]   ;;  %s438_s7 = inlined_call_operand.hbm [shape: f32[8,128], index: 7, kind: output, shape index: {}]  }
   0x1   :  { %13 = vsyncpa [#allocation6], 0 }
   0x2   :  { %14 = vsyncpa [#allocation9], 0  ;;  %s31_s26 = sshll.u32 %s432_s1, 4  ;;  %s32_s26 = int_to_ptr.hbm [resolvable:$true] %s31_s26 }
   0x3   :  { %15 = vsyncpa [#allocation4], 0  ;;  %s360_s27 = smov [#allocation5]   ;;  %s21_s8 = sshll.u32 %s431_s0, 4  ;;  %s22_s8 = int_to_ptr.hbm [resolvable:$true] %s21_s8 }
   0x4   :  { %s33_s28 = sshll.u32 %s360_s27, 4  ;;  %s361_s9 = smov 128   ;;  %s34_s28 = int_to_ptr.vmem [resolvable:$true] %s33_s28 }
   0x5   :  { %s362_s10 = smov 8   ;;  %s363_s11 = smov [#allocation2]  }
   0x6   :  { %39 = dma.hbm_to_vmem [thread:$0]  %s32_s26, 256, %s34_s28, [#allocation6], %s361_s9, %s361_s9, %s362_s10  }
   0x7   :  { %s23_s12 = sshll.u32 %s363_s11, 4  ;;  %s46_s15 = sshll.u32 %s434_s3, 4  ;;  %s24_s12 = int_to_ptr.vmem [resolvable:$true] %s23_s12  ;;  %s47_s15 = int_to_ptr.hbm [resolvable:$true] %s46_s15 }
   0x8   :  { %26 = dma.hbm_to_vmem [thread:$0]  %s22_s8, 128, %s24_s12, [#allocation3]  }
   0x9   :  { %s61_s17 = sshll.u32 %s436_s5, 4  ;;  %s364_s18 = smov [#allocation7]   ;;  %s62_s17 = int_to_ptr.hbm [resolvable:$true] %s61_s17 }
   0xa   :  { %s48_s19 = sshll.u32 %s364_s18, 4  ;;  %s365_s0 = smov [#allocation8]   ;;  %s49_s19 = int_to_ptr.vmem [resolvable:$true] %s48_s19 }
   0xb   :  { %54 = dma.hbm_to_vmem [thread:$0]  %s47_s15, 2048, %s49_s19, [#allocation6], %s361_s9, %s361_s9, %s362_s10  }
   0xc   :  { %s63_s20 = sshll.u32 %s365_s0, 4  ;;  %s64_s20 = int_to_ptr.vmem [resolvable:$true] %s63_s20 }
   0xd   :  { %69 = dma.hbm_to_vmem [thread:$0]  %s62_s17, 2048, %s64_s20, [#allocation9], %s361_s9, %s361_s9, %s362_s10  }
   0xe   :  { %352 = dma.done.wait [#allocation3], 128  }
   0xf   :  { %353 = vsyncadd [#allocation3], 4294967168 }
  0x10   :  { %354 = dma.done.wait [#allocation6], 2304  }
  0x11   :  { %355 = vsyncadd [#allocation6], 4294964992 }
  0x12   :  { %356 = dma.done.wait [#allocation9], 2048  }
  0x13   :  { %357 = vsyncadd [#allocation9], 4294965248  ;;  %v90_v0 = vld [vmem:[#allocation5 + $0x8] sm:$0xff]  ;;  %v89_v1 = vld [vmem:[#allocation5] sm:$0xff]  ;;  %vm95_vm0 = vcmask 130048   ;;  %s366_s24 = smov [#allocation10]  }
  0x14   :  { %113 = vmatpush.msra.mxu0 %v90_v0  ;;  %v88_v2 = vld [vmem:[#allocation2] sm:$0xff]  ;;  %v135_v3 = vld [vmem:[#allocation7 + $0x78] sm:$0xff]  ;;  %v134_v4 = vld [vmem:[#allocation7 + $0x70] sm:$0xff]  ;;  %s207_s25 = sshll.u32 %s366_s24, 4  ;;  %s209_s28 = sshll.u32 %s438_s7, 4  ;;  %s208_s25 = int_to_ptr.vmem [resolvable:$true] %s207_s25  ;;  %s210_s28 = int_to_ptr.hbm [resolvable:$true] %s209_s28 }
  0x15   :  { %140 = vmatpush.msra.mxu1 %v135_v3  ;;  %v133_v5 = vld [vmem:[#allocation7 + $0x68] sm:$0xff]  ;;  %v132_v6 = vld [vmem:[#allocation7 + $0x60] sm:$0xff]  ;;  %v131_v7 = vld [vmem:[#allocation7 + $0x58] sm:$0xff] }
  0x16   :  { %114 = vmatpush.msra.mxu0 %v89_v1  ;;  %v130_v8 = vld [vmem:[#allocation7 + $0x50] sm:$0xff]  ;;  %v129_v9 = vld [vmem:[#allocation7 + $0x48] sm:$0xff]  ;;  %v128_v10 = vld [vmem:[#allocation7 + $0x40] sm:$0xff] }
  0x17   :  { %221 = vmatmul.msk.f32.vlgmr.msra.gmra.mxu0 %vm95_vm0, %v88_v2  ;;  %141 = vmatpush.msra.mxu1 %v134_v4  ;;  %v127_v11 = vld [vmem:[#allocation7 + $0x38] sm:$0xff]  ;;  %v126_v12 = vld [vmem:[#allocation7 + $0x30] sm:$0xff]  ;;  %v125_v13 = vld [vmem:[#allocation7 + $0x28] sm:$0xff] }
  0x18   :  { %v124_v14 = vld [vmem:[#allocation7 + $0x20] sm:$0xff]  ;;  %v123_v15 = vld [vmem:[#allocation7 + $0x18] sm:$0xff]  ;;  %v122_v16 = vld [vmem:[#allocation7 + $0x10] sm:$0xff] }
  0x19   :  { %142 = vmatpush.msra.mxu1 %v133_v5  ;;  %v121_v17 = vld [vmem:[#allocation7 + $0x8] sm:$0xff]  ;;  %v120_v18 = vld [vmem:[#allocation7] sm:$0xff]  ;;  %v176_v19 = vld [vmem:[#allocation8 + $0x78] sm:$0xff] }
  0x1a   :  { %v175_v20 = vld [vmem:[#allocation8 + $0x70] sm:$0xff]  ;;  %181 = vmatpush.msra.mxu2 %v176_v19  ;;  %v174_v21 = vld [vmem:[#allocation8 + $0x68] sm:$0xff]  ;;  %v173_v22 = vld [vmem:[#allocation8 + $0x60] sm:$0xff] }
  0x1b   :  { %143 = vmatpush.msra.mxu1 %v132_v6  ;;  %v172_v23 = vld [vmem:[#allocation8 + $0x58] sm:$0xff]  ;;  %v171_v24 = vld [vmem:[#allocation8 + $0x50] sm:$0xff]  ;;  %v170_v25 = vld [vmem:[#allocation8 + $0x48] sm:$0xff] }
  0x1c   :  { %182 = vmatpush.msra.mxu2 %v175_v20  ;;  %v169_v26 = vld [vmem:[#allocation8 + $0x40] sm:$0xff]  ;;  %v168_v27 = vld [vmem:[#allocation8 + $0x38] sm:$0xff]  ;;  %v167_v28 = vld [vmem:[#allocation8 + $0x30] sm:$0xff] }
  0x1d   :  { %144 = vmatpush.msra.mxu1 %v131_v7  ;;  %v166_v29 = vld [vmem:[#allocation8 + $0x28] sm:$0xff]  ;;  %v165_v30 = vld [vmem:[#allocation8 + $0x20] sm:$0xff]  ;;  %v164_v31 = vld [vmem:[#allocation8 + $0x18] sm:$0xff] }
  0x1e   :  { %183 = vmatpush.msra.mxu2 %v174_v21  ;;  %v229_v32 = vld [vmem:[%s433_s2] ss:$0 sm:$0xff]  ;;  %v163_v36 = vld [vmem:[#allocation8 + $0x10] sm:$0xff]  ;;  %v161_v38 = vld [vmem:[#allocation8] sm:$0xff] }
  0x1f   :  { %145 = vmatpush.msra.mxu1 %v130_v8  ;;  %v162_v37 = vld [vmem:[#allocation8 + $0x8] sm:$0xff] }
  0x20   :  { %184 = vmatpush.msra.mxu2 %v173_v22  ;;  %v230_v39 = vld [vmem:[%s435_s4] ss:$0 sm:$0xff] }
  0x21   :  { %146 = vmatpush.msra.mxu1 %v129_v9  ;;  %v231_v43 = vld [vmem:[%s437_s6] ss:$0 sm:$0xff] }
  0x22   :  { %185 = vmatpush.msra.mxu2 %v172_v23 }
  0x23   :  { %147 = vmatpush.msra.mxu1 %v128_v10 }
  0x24   :  { %186 = vmatpush.msra.mxu2 %v171_v24 }
  0x25   :  { %148 = vmatpush.msra.mxu1 %v127_v11 }
  0x26   :  { %187 = vmatpush.msra.mxu2 %v170_v25 }
  0x27   :  { %149 = vmatpush.msra.mxu1 %v126_v12 }
  0x28   :  { %188 = vmatpush.msra.mxu2 %v169_v26 }
  0x29   :  { %150 = vmatpush.msra.mxu1 %v125_v13 }
  0x2a   :  { %189 = vmatpush.msra.mxu2 %v168_v27 }
  0x2b   :  { %151 = vmatpush.msra.mxu1 %v124_v14 }
  0x2c   :  { %190 = vmatpush.msra.mxu2 %v167_v28 }
  0x2d   :  { %152 = vmatpush.msra.mxu1 %v123_v15 }
  0x2e   :  { %191 = vmatpush.msra.mxu2 %v166_v29 }
  0x2f   :  { %153 = vmatpush.msra.mxu1 %v122_v16 }
  0x30   :  { %192 = vmatpush.msra.mxu2 %v165_v30 }
  0x31   :  { %154 = vmatpush.msra.mxu1 %v121_v17 }
  0x32   :  { %193 = vmatpush.msra.mxu2 %v164_v31 }
  0x33   :  { %155 = vmatpush.msra.mxu1 %v120_v18 }
  0x34   :  { %194 = vmatpush.msra.mxu2 %v163_v36 }
  0x36   :  { %195 = vmatpush.msra.mxu2 %v162_v37 }
  0x38   :  { %196 = vmatpush.msra.mxu2 %v161_v38 }
  0x94   :  { %v116_v33 = vpop.f32.mrf.mxu0 }
  0x95   :  { %v117_v34 = vadd.f32 %v229_v32, %v116_v33 }
  0x97   :  { %v119_v35 = vmax.f32 %v117_v34, 0.0 }
  0x99   :  { %156 = vmatmul.f32.vlgmr.msra.gmra.mxu1 %v119_v35 }
 0x116   :  { %v157_v40 = vpop.f32.mrf.mxu1 }
 0x117   :  { %v158_v41 = vadd.f32 %v230_v39, %v157_v40 }
 0x119   :  { %v160_v42 = vmax.f32 %v158_v41, 0.0 }
 0x11b   :  { %197 = vmatmul.f32.vlgmr.msra.gmra.mxu2 %v160_v42 }
 0x19e   :  { %v198_v44 = vpop.f32.mrf.mxu2 }
 0x19f   :  { %v199_v45 = vadd.f32 %v231_v43, %v198_v44 }
 0x1a1   :  { %201 = vst [vmem:[#allocation10] sm:$0xff] %v199_v45 }
 0x1a2   :  { %212 = dma.vmem_to_hbm [thread:$0]  %s208_s25, 128, %s210_s28, [#allocation4]  }
 0x1a3   :  { %358 = dma.done.wait [#allocation4], 128  }
 0x1a4   :  { %359 = vsyncadd [#allocation4], 4294967168 }
 0x1a5   :  { %217 = vsyncpa [#allocation3], 1 }
 0x1a6   :  { %218 = vsyncpa [#allocation6], 1 }
 0x1a7   :  { %219 = vsyncpa [#allocation9], 1 }
 0x1a8   :  { %220 = vsyncpa [#allocation4], 1 }

</bundles_post_ra>
